<compile_context>
chip_gen: v6e
topology: v6e:2x2x1
jax: 0.10.0
libtpu: 0.0.40
codegen_flags: <defaults>
</compile_context>

<pallas_src>
import functools

import jax
import jax.numpy as jnp
from jax.experimental import pallas as pl
from jax.experimental import pallas as _pl_unused  # noqa: F401
from jax.experimental.pallas import tpu as pltpu


# ------------------------------ host-side glue ------------------------------


def extract_patches(x, patch):
    """NCHW image -> [B, num_patches, 3*P*P] im2col of the stride-P conv."""
    b, c, h, w = x.shape
    nh, nw = h // patch, w // patch
    x = x.reshape(b, c, nh, patch, nw, patch)
    x = x.transpose(0, 2, 4, 1, 3, 5)            # [B, nh, nw, C, P, P]
    return x.reshape(b, nh * nw, c * patch * patch)


# ------------------------------ Pallas kernel -------------------------------


def _fused_kernel(patch_ref, wap_ref, bap_ref, wah_ref, bah_ref,
                  w1_ref, b1_ref, w2_ref, b2_ref,
                  pool_ref, exp_ref, rd_ref, idd_ref, rf_ref, idf_ref,
                  out_ref, *, dim, feat, ntask):
    """Fused MetaNetImageEncoder forward for one batch block.

    patch_ref : [BLK*N, CP]        bf16 im2col patches
    wap/bap   : [CP, T*D+D] bf16 / [1, T*D+D] f32   fused [deltas | base] patch embed
    wah/bah   : [D, T*F+F]  bf16 / [1, T*F+F] f32   fused [deltas | base] head
    w1/b1/w2/b2 : MetaNet bottleneck MLP
    pool_ref  : [BLK, BLK*N] bf16  block-diagonal 1/N averaging matrix
    exp_ref   : [BLK*N, BLK] bf16  patch-expansion one-hot matrix
    rd/rf     : [T, T*D] / [T, T*F] bf16  coefficient lane-replication matrices
    idd/idf   : [T*D, D] / [T*F, F] bf16  block-identity group-reduction matrices
    out_ref   : [BLK, F] f32
    """
    f32 = jnp.float32
    bf16 = jnp.bfloat16
    td_cols = ntask * dim
    tf_cols = ntask * feat

    patches = patch_ref[...]                                       # [NP, CP] bf16

    # One fused patch-embed matmul produces both delta and base token streams.
    tok_all = jnp.dot(patches, wap_ref[...],
                      preferred_element_type=f32) + bap_ref[...]   # [NP, T*D+D]
    tok_delta = tok_all[:, :td_cols]                                # [NP, T*D]
    tok_base = tok_all[:, td_cols:]                                 # [NP, D]

    # ---- pass 1: base encode (pooling = averaging matmul on the MXU) ----
    pooled_base = jnp.dot(pool_ref[...],
                          jnp.maximum(tok_base, 0.0).astype(bf16),
                          preferred_element_type=f32)               # [BLK, D]
    head1 = jnp.dot(pooled_base.astype(bf16), wah_ref[...],
                    preferred_element_type=f32) + bah_ref[...]      # [BLK, T*F+F]
    feat_base = head1[:, tf_cols:]                                  # [BLK, F]

    # ---- MetaNet bottleneck MLP (whole block at once) ----
    hid = jnp.maximum(jnp.dot(feat_base.astype(bf16), w1_ref[...],
                              preferred_element_type=f32) + b1_ref[...], 0.0)
    coefs = jnp.dot(hid.astype(bf16), w2_ref[...],
                    preferred_element_type=f32) + b2_ref[...]       # [BLK, T]
    coefs16 = coefs.astype(bf16)

    # ---- pass 2: composed re-encode, composition fully on the MXU ----
    # Per-patch, lane-replicated coefficients: E @ (coefs @ R)  (pure 0/1 ops).
    crep_d = jnp.dot(
        exp_ref[...],
        jnp.dot(coefs16, rd_ref[...], preferred_element_type=f32).astype(bf16),
        preferred_element_type=f32)                                 # [NP, T*D]
    # Group reduction over tasks via block-identity matmul.
    composed = jnp.dot((crep_d * tok_delta).astype(bf16), idd_ref[...],
                       preferred_element_type=f32)                  # [NP, D]
    tok_c = jnp.maximum(tok_base + composed, 0.0)
    pooled_c = jnp.dot(pool_ref[...], tok_c.astype(bf16),
                       preferred_element_type=f32)                  # [BLK, D]

    head2 = jnp.dot(pooled_c.astype(bf16), wah_ref[...],
                    preferred_element_type=f32) + bah_ref[...]      # [BLK, T*F+F]
    head_delta = head2[:, :tf_cols]
    head_base = head2[:, tf_cols:]
    crep_f = jnp.dot(coefs16, rf_ref[...], preferred_element_type=f32)  # [BLK, T*F]
    out = head_base + jnp.dot((crep_f * head_delta).astype(bf16), idf_ref[...],
                              preferred_element_type=f32)           # [BLK, F]
    out_ref[...] = out                     # single lane-dense store per block


# -------------------------------- wrapper -----------------------------------


def metanet_image_encoder_forward(x, params, dparams, mn_params, patch,
                                  *, batch_block=None):
    """Pallas equivalent of MetaNetImageEncoder.forward (blockwise=False).

    x: [B, 3, H, W] NCHW images.  Returns features [B, F], matching
    torch.cat([func(new_params_i, buffer, x[i:i+1]) for i], dim=0).
    """
    wp, bp, wh, bh = params
    dwp, dbp, dwh, dbh = dparams
    w1, b1, w2, b2 = mn_params
    bsz = x.shape[0]
    ntask, cp, d = dwp.shape
    f = wh.shape[1]
    n = (x.shape[2] // patch) * (x.shape[3] // patch)

    blk = batch_block or min(bsz, 8)
    assert bsz % blk == 0, (bsz, blk)
    np_blk = blk * n

    patches = extract_patches(x, patch).reshape(bsz * n, cp)

    bf16 = jnp.bfloat16

    # Fused [deltas | base] weight layouts (delta block first -> stays
    # 128-lane aligned; one-time host-side parameter re-layout).
    dwp_flat = dwp.transpose(1, 0, 2).reshape(cp, ntask * d)
    dbp_flat = dbp.reshape(1, ntask * d)
    dwh_flat = dwh.transpose(1, 0, 2).reshape(d, ntask * f)
    dbh_flat = dbh.reshape(1, ntask * f)
    w_all_p = jnp.concatenate([dwp_flat, wp], axis=1).astype(bf16)   # [CP, T*D+D]
    b_all_p = jnp.concatenate([dbp_flat, bp], axis=1)                # [1,  T*D+D]
    w_all_h = jnp.concatenate([dwh_flat, wh], axis=1).astype(bf16)   # [D,  T*F+F]
    b_all_h = jnp.concatenate([dbh_flat, bh], axis=1)                # [1,  T*F+F]

    # Tiny 0/1-valued host constants that move pooling + composition to MXU.
    eye_b = jnp.eye(blk, dtype=jnp.float32)
    pool = (jnp.repeat(eye_b, n, axis=1) / n).astype(bf16)           # [BLK, BLK*N]
    expand = jnp.repeat(eye_b, n, axis=0).astype(bf16)               # [BLK*N, BLK]
    eye_t = jnp.eye(ntask, dtype=jnp.float32)
    r_d = jnp.repeat(eye_t, d, axis=1).astype(bf16)                  # [T, T*D]
    r_f = jnp.repeat(eye_t, f, axis=1).astype(bf16)                  # [T, T*F]
    blkid_d = jnp.tile(jnp.eye(d, dtype=jnp.float32), (ntask, 1)).astype(bf16)
    blkid_f = jnp.tile(jnp.eye(f, dtype=jnp.float32), (ntask, 1)).astype(bf16)

    kernel = functools.partial(_fused_kernel, dim=d, feat=f, ntask=ntask)

    def bcast(arr):
        return pl.BlockSpec(arr.shape, lambda i: (0, 0))

    patches16 = patches.astype(bf16)
    w1_16 = w1.astype(bf16)
    w2_16 = w2.astype(bf16)

    # Batch-block grid, marked "parallel" so v7x's second TensorCore is used
    # once the batch is non-trivial; the entire per-block working set (~60 KB
    # at these shapes) is VMEM-resident, so intermediates never touch HBM.
    return pl.pallas_call(
        kernel,
        out_shape=jax.ShapeDtypeStruct((bsz, f), jnp.float32),
        grid=(bsz // blk,),
        in_specs=[
            pl.BlockSpec((np_blk, cp), lambda i: (i, 0)),            # patches
            bcast(w_all_p), bcast(b_all_p),
            bcast(w_all_h), bcast(b_all_h),
            bcast(w1_16), bcast(b1), bcast(w2_16), bcast(b2),
            bcast(pool), bcast(expand),
            bcast(r_d), bcast(blkid_d), bcast(r_f), bcast(blkid_f),
        ],
        out_specs=pl.BlockSpec((blk, f), lambda i: (i, 0)),
        compiler_params=pltpu.CompilerParams(
            dimension_semantics=("parallel",)),
    )(patches16,
      w_all_p, b_all_p, w_all_h, b_all_h,
      w1_16, b1, w2_16, b2,
      pool, expand, r_d, blkid_d, r_f, blkid_f)


# ---------------------------- pure-JAX reference ----------------------------


def _ref_encode(patches_i, wp, bp, wh, bh):
    tok = jnp.maximum(patches_i @ wp + bp, 0.0)
    pooled = tok.mean(axis=0, keepdims=True)
    return pooled @ wh + bh


def reference_forward(x, params, dparams, mn_params, patch):
    wp, bp, wh, bh = params
    dwp, dbp, dwh, dbh = dparams
    w1, b1, w2, b2 = mn_params
    patches = extract_patches(x, patch)
    bsz = x.shape[0]
    base = jnp.concatenate(
        [_ref_encode(patches[i], wp, bp, wh, bh) for i in range(bsz)], axis=0)
    hidden = jnp.maximum(base @ w1 + b1, 0.0)
    coefs = hidden @ w2 + b2
    outs = []
    for i in range(bsz):
        c = coefs[i]
        wpi = wp + jnp.einsum("t,tab->ab", c, dwp)
        bpi = bp + jnp.einsum("t,tab->ab", c, dbp)
        whi = wh + jnp.einsum("t,tab->ab", c, dwh)
        bhi = bh + jnp.einsum("t,tab->ab", c, dbh)
        outs.append(_ref_encode(patches[i], wpi, bpi, whi, bhi))
    return jnp.concatenate(outs, axis=0)


if __name__ == "__main__":
    # Small shapes consistent with the module's forward: x is [B, 3, H, W].
    B, C, H, W = 2, 3, 16, 16
    P = 4                      # conv kernel == stride (patch embed)
    N = (H // P) * (W // P)    # 16 patches per image
    CP = C * P * P             # 48 im2col features per patch
    D = 32                     # embed dim
    F = 32                     # encoder output feature dim
    T = 4                      # number of task vectors  (T*D = T*F = 128 lanes)
    HID = max(F // 4, T)       # MetaNet hidden dim -> 8

    key = jax.random.PRNGKey(0)
    ks = jax.random.split(key, 13)

    x = jax.random.normal(ks[0], (B, C, H, W), jnp.float32)

    # Base encoder params (conv weight stored flattened & transposed: [Cp, D]).
    wp = 0.02 * jax.random.normal(ks[1], (CP, D), jnp.float32)
    bp = 0.02 * jax.random.normal(ks[2], (1, D), jnp.float32)
    wh = 0.02 * jax.random.normal(ks[3], (D, F), jnp.float32)
    bh = 0.02 * jax.random.normal(ks[4], (1, F), jnp.float32)
    params = (wp, bp, wh, bh)

    # Task vectors: one delta per parameter block, stacked over the T tasks.
    dwp = 0.05 * jax.random.normal(ks[5], (T, CP, D), jnp.float32)
    dbp = 0.05 * jax.random.normal(ks[6], (T, 1, D), jnp.float32)
    dwh = 0.05 * jax.random.normal(ks[7], (T, D, F), jnp.float32)
    dbh = 0.05 * jax.random.normal(ks[8], (T, 1, F), jnp.float32)
    dparams = (dwp, dbp, dwh, dbh)

    # MetaNet (Linear(F, HID) -> ReLU -> Linear(HID, T)).
    w1 = 0.01 * jax.random.normal(ks[9], (F, HID), jnp.float32)
    b1 = 0.01 * jax.random.normal(ks[10], (1, HID), jnp.float32)
    w2 = 0.10 * jax.random.normal(ks[11], (HID, T), jnp.float32)
    b2 = 0.10 * jax.random.normal(ks[12], (1, T), jnp.float32)
    mn_params = (w1, b1, w2, b2)

    out = metanet_image_encoder_forward(x, params, dparams, mn_params, P)
    out = jax.block_until_ready(out)
    assert out.shape == (B, F), out.shape

    ref = reference_forward(x, params, dparams, mn_params, P)
    # bf16 matmul operands (f32 accumulation) -> relaxed tolerance vs f32 ref.
    assert jnp.allclose(out, ref, atol=3e-3, rtol=2e-2), (
        float(jnp.max(jnp.abs(out - ref))))

    print("KERNEL_OK")
</pallas_src>

<mosaic_0001>
module attributes {stable_mosaic.version = 11 : i64} {
  func.func @_fused_kernel(%arg0: i32, %arg1: memref<32x48xbf16, #tpu.memory_space<vmem>>, %arg2: memref<48x160xbf16, #tpu.memory_space<vmem>>, %arg3: memref<1x160xf32, #tpu.memory_space<vmem>>, %arg4: memref<32x160xbf16, #tpu.memory_space<vmem>>, %arg5: memref<1x160xf32, #tpu.memory_space<vmem>>, %arg6: memref<32x8xbf16, #tpu.memory_space<vmem>>, %arg7: memref<1x8xf32, #tpu.memory_space<vmem>>, %arg8: memref<8x4xbf16, #tpu.memory_space<vmem>>, %arg9: memref<1x4xf32, #tpu.memory_space<vmem>>, %arg10: memref<2x32xbf16, #tpu.memory_space<vmem>>, %arg11: memref<32x2xbf16, #tpu.memory_space<vmem>>, %arg12: memref<4x128xbf16, #tpu.memory_space<vmem>>, %arg13: memref<128x32xbf16, #tpu.memory_space<vmem>>, %arg14: memref<4x128xbf16, #tpu.memory_space<vmem>>, %arg15: memref<128x32xbf16, #tpu.memory_space<vmem>>, %arg16: memref<2x32xf32, #tpu.memory_space<vmem>>) attributes {dimension_semantics = [#tpu.dimension_semantics<parallel>], iteration_bounds = array<i64: 1>, scalar_prefetch = 0 : i64, scratch_operands = 0 : i64, tpu.core_type = #tpu.core_type<tc>, window_params = [{transform_indices = @transform_0, window_bounds = array<i64: 32, 48>}, {pipeline_mode = #tpu.pipeline_mode<synchronous>, transform_indices = @transform_1, window_bounds = array<i64: 48, 160>}, {pipeline_mode = #tpu.pipeline_mode<synchronous>, transform_indices = @transform_2, window_bounds = array<i64: 1, 160>}, {pipeline_mode = #tpu.pipeline_mode<synchronous>, transform_indices = @transform_3, window_bounds = array<i64: 32, 160>}, {pipeline_mode = #tpu.pipeline_mode<synchronous>, transform_indices = @transform_4, window_bounds = array<i64: 1, 160>}, {pipeline_mode = #tpu.pipeline_mode<synchronous>, transform_indices = @transform_5, window_bounds = array<i64: 32, 8>}, {pipeline_mode = #tpu.pipeline_mode<synchronous>, transform_indices = @transform_6, window_bounds = array<i64: 1, 8>}, {pipeline_mode = #tpu.pipeline_mode<synchronous>, transform_indices = @transform_7, window_bounds = array<i64: 8, 4>}, {pipeline_mode = #tpu.pipeline_mode<synchronous>, transform_indices = @transform_8, window_bounds = array<i64: 1, 4>}, {pipeline_mode = #tpu.pipeline_mode<synchronous>, transform_indices = @transform_9, window_bounds = array<i64: 2, 32>}, {pipeline_mode = #tpu.pipeline_mode<synchronous>, transform_indices = @transform_10, window_bounds = array<i64: 32, 2>}, {pipeline_mode = #tpu.pipeline_mode<synchronous>, transform_indices = @transform_11, window_bounds = array<i64: 4, 128>}, {pipeline_mode = #tpu.pipeline_mode<synchronous>, transform_indices = @transform_12, window_bounds = array<i64: 128, 32>}, {pipeline_mode = #tpu.pipeline_mode<synchronous>, transform_indices = @transform_13, window_bounds = array<i64: 4, 128>}, {pipeline_mode = #tpu.pipeline_mode<synchronous>, transform_indices = @transform_14, window_bounds = array<i64: 128, 32>}, {transform_indices = @transform_15, window_bounds = array<i64: 2, 32>}]} {
    %c0 = arith.constant 0 : index
    %c0_0 = arith.constant 0 : index
    %0 = vector.load %arg1[%c0, %c0_0] : memref<32x48xbf16, #tpu.memory_space<vmem>>, vector<32x48xbf16>
    %c0_1 = arith.constant 0 : index
    %c0_2 = arith.constant 0 : index
    %1 = vector.load %arg2[%c0_1, %c0_2] : memref<48x160xbf16, #tpu.memory_space<vmem>>, vector<48x160xbf16>
    %cst = arith.constant dense<0.000000e+00> : vector<32x160xf32>
    %2 = tpu.matmul %0, %1, %cst {dimension_numbers = #tpu.dot_dimension_numbers<[1], [0], [0], [1], [0, 0, 1, 1], [], []>} : vector<32x48xbf16>, vector<48x160xbf16>, vector<32x160xf32> -> vector<32x160xf32>
    %c0_3 = arith.constant 0 : index
    %c0_4 = arith.constant 0 : index
    %3 = vector.load %arg3[%c0_3, %c0_4] : memref<1x160xf32, #tpu.memory_space<vmem>>, vector<1x160xf32>
    %4 = vector.broadcast %3 : vector<1x160xf32> to vector<32x160xf32>
    %5 = arith.addf %2, %4 : vector<32x160xf32>
    %6 = vector.extract_strided_slice %5 {offsets = [0, 0], sizes = [32, 128], strides = [1, 1]} : vector<32x160xf32> to vector<32x128xf32>
    %7 = vector.extract_strided_slice %5 {offsets = [0, 128], sizes = [32, 32], strides = [1, 1]} : vector<32x160xf32> to vector<32x32xf32>
    %c0_5 = arith.constant 0 : index
    %c0_6 = arith.constant 0 : index
    %8 = vector.load %arg10[%c0_5, %c0_6] : memref<2x32xbf16, #tpu.memory_space<vmem>>, vector<2x32xbf16>
    %cst_7 = arith.constant 0.000000e+00 : f32
    %9 = vector.broadcast %cst_7 : f32 to vector<32x32xf32>
    %10 = arith.maximumf %7, %9 : vector<32x32xf32>
    %11 = arith.truncf %10 : vector<32x32xf32> to vector<32x32xbf16>
    %cst_8 = arith.constant dense<0.000000e+00> : vector<2x32xf32>
    %12 = tpu.matmul %8, %11, %cst_8 {dimension_numbers = #tpu.dot_dimension_numbers<[1], [0], [0], [1], [0, 0, 1, 1], [], []>} : vector<2x32xbf16>, vector<32x32xbf16>, vector<2x32xf32> -> vector<2x32xf32>
    %13 = arith.truncf %12 : vector<2x32xf32> to vector<2x32xbf16>
    %c0_9 = arith.constant 0 : index
    %c0_10 = arith.constant 0 : index
    %14 = vector.load %arg4[%c0_9, %c0_10] : memref<32x160xbf16, #tpu.memory_space<vmem>>, vector<32x160xbf16>
    %cst_11 = arith.constant dense<0.000000e+00> : vector<2x160xf32>
    %15 = tpu.matmul %13, %14, %cst_11 {dimension_numbers = #tpu.dot_dimension_numbers<[1], [0], [0], [1], [0, 0, 1, 1], [], []>} : vector<2x32xbf16>, vector<32x160xbf16>, vector<2x160xf32> -> vector<2x160xf32>
    %c0_12 = arith.constant 0 : index
    %c0_13 = arith.constant 0 : index
    %16 = vector.load %arg5[%c0_12, %c0_13] : memref<1x160xf32, #tpu.memory_space<vmem>>, vector<1x160xf32>
    %17 = vector.broadcast %16 : vector<1x160xf32> to vector<2x160xf32>
    %18 = arith.addf %15, %17 : vector<2x160xf32>
    %19 = vector.extract_strided_slice %18 {offsets = [0, 128], sizes = [2, 32], strides = [1, 1]} : vector<2x160xf32> to vector<2x32xf32>
    %20 = arith.truncf %19 : vector<2x32xf32> to vector<2x32xbf16>
    %c0_14 = arith.constant 0 : index
    %c0_15 = arith.constant 0 : index
    %21 = vector.load %arg6[%c0_14, %c0_15] : memref<32x8xbf16, #tpu.memory_space<vmem>>, vector<32x8xbf16>
    %cst_16 = arith.constant dense<0.000000e+00> : vector<2x8xf32>
    %22 = tpu.matmul %20, %21, %cst_16 {dimension_numbers = #tpu.dot_dimension_numbers<[1], [0], [0], [1], [0, 0, 1, 1], [], []>} : vector<2x32xbf16>, vector<32x8xbf16>, vector<2x8xf32> -> vector<2x8xf32>
    %c0_17 = arith.constant 0 : index
    %c0_18 = arith.constant 0 : index
    %23 = vector.load %arg7[%c0_17, %c0_18] : memref<1x8xf32, #tpu.memory_space<vmem>>, vector<1x8xf32>
    %24 = vector.broadcast %23 : vector<1x8xf32> to vector<2x8xf32>
    %25 = arith.addf %22, %24 : vector<2x8xf32>
    %cst_19 = arith.constant 0.000000e+00 : f32
    %26 = vector.broadcast %cst_19 : f32 to vector<2x8xf32>
    %27 = arith.maximumf %25, %26 : vector<2x8xf32>
    %28 = arith.truncf %27 : vector<2x8xf32> to vector<2x8xbf16>
    %c0_20 = arith.constant 0 : index
    %c0_21 = arith.constant 0 : index
    %29 = vector.load %arg8[%c0_20, %c0_21] : memref<8x4xbf16, #tpu.memory_space<vmem>>, vector<8x4xbf16>
    %cst_22 = arith.constant dense<0.000000e+00> : vector<2x4xf32>
    %30 = tpu.matmul %28, %29, %cst_22 {dimension_numbers = #tpu.dot_dimension_numbers<[1], [0], [0], [1], [0, 0, 1, 1], [], []>} : vector<2x8xbf16>, vector<8x4xbf16>, vector<2x4xf32> -> vector<2x4xf32>
    %c0_23 = arith.constant 0 : index
    %c0_24 = arith.constant 0 : index
    %31 = vector.load %arg9[%c0_23, %c0_24] : memref<1x4xf32, #tpu.memory_space<vmem>>, vector<1x4xf32>
    %32 = vector.broadcast %31 : vector<1x4xf32> to vector<2x4xf32>
    %33 = arith.addf %30, %32 : vector<2x4xf32>
    %34 = arith.truncf %33 : vector<2x4xf32> to vector<2x4xbf16>
    %c0_25 = arith.constant 0 : index
    %c0_26 = arith.constant 0 : index
    %35 = vector.load %arg11[%c0_25, %c0_26] : memref<32x2xbf16, #tpu.memory_space<vmem>>, vector<32x2xbf16>
    %c0_27 = arith.constant 0 : index
    %c0_28 = arith.constant 0 : index
    %36 = vector.load %arg12[%c0_27, %c0_28] : memref<4x128xbf16, #tpu.memory_space<vmem>>, vector<4x128xbf16>
    %cst_29 = arith.constant dense<0.000000e+00> : vector<2x128xf32>
    %37 = tpu.matmul %34, %36, %cst_29 {dimension_numbers = #tpu.dot_dimension_numbers<[1], [0], [0], [1], [0, 0, 1, 1], [], []>} : vector<2x4xbf16>, vector<4x128xbf16>, vector<2x128xf32> -> vector<2x128xf32>
    %38 = arith.truncf %37 : vector<2x128xf32> to vector<2x128xbf16>
    %cst_30 = arith.constant dense<0.000000e+00> : vector<32x128xf32>
    %39 = tpu.matmul %35, %38, %cst_30 {dimension_numbers = #tpu.dot_dimension_numbers<[1], [0], [0], [1], [0, 0, 1, 1], [], []>} : vector<32x2xbf16>, vector<2x128xbf16>, vector<32x128xf32> -> vector<32x128xf32>
    %40 = arith.mulf %39, %6 : vector<32x128xf32>
    %41 = arith.truncf %40 : vector<32x128xf32> to vector<32x128xbf16>
    %c0_31 = arith.constant 0 : index
    %c0_32 = arith.constant 0 : index
    %42 = vector.load %arg13[%c0_31, %c0_32] : memref<128x32xbf16, #tpu.memory_space<vmem>>, vector<128x32xbf16>
    %cst_33 = arith.constant dense<0.000000e+00> : vector<32x32xf32>
    %43 = tpu.matmul %41, %42, %cst_33 {dimension_numbers = #tpu.dot_dimension_numbers<[1], [0], [0], [1], [0, 0, 1, 1], [], []>} : vector<32x128xbf16>, vector<128x32xbf16>, vector<32x32xf32> -> vector<32x32xf32>
    %44 = arith.addf %7, %43 : vector<32x32xf32>
    %cst_34 = arith.constant 0.000000e+00 : f32
    %45 = vector.broadcast %cst_34 : f32 to vector<32x32xf32>
    %46 = arith.maximumf %44, %45 : vector<32x32xf32>
    %c0_35 = arith.constant 0 : index
    %c0_36 = arith.constant 0 : index
    %47 = vector.load %arg10[%c0_35, %c0_36] : memref<2x32xbf16, #tpu.memory_space<vmem>>, vector<2x32xbf16>
    %48 = arith.truncf %46 : vector<32x32xf32> to vector<32x32xbf16>
    %cst_37 = arith.constant dense<0.000000e+00> : vector<2x32xf32>
    %49 = tpu.matmul %47, %48, %cst_37 {dimension_numbers = #tpu.dot_dimension_numbers<[1], [0], [0], [1], [0, 0, 1, 1], [], []>} : vector<2x32xbf16>, vector<32x32xbf16>, vector<2x32xf32> -> vector<2x32xf32>
    %50 = arith.truncf %49 : vector<2x32xf32> to vector<2x32xbf16>
    %c0_38 = arith.constant 0 : index
    %c0_39 = arith.constant 0 : index
    %51 = vector.load %arg4[%c0_38, %c0_39] : memref<32x160xbf16, #tpu.memory_space<vmem>>, vector<32x160xbf16>
    %cst_40 = arith.constant dense<0.000000e+00> : vector<2x160xf32>
    %52 = tpu.matmul %50, %51, %cst_40 {dimension_numbers = #tpu.dot_dimension_numbers<[1], [0], [0], [1], [0, 0, 1, 1], [], []>} : vector<2x32xbf16>, vector<32x160xbf16>, vector<2x160xf32> -> vector<2x160xf32>
    %c0_41 = arith.constant 0 : index
    %c0_42 = arith.constant 0 : index
    %53 = vector.load %arg5[%c0_41, %c0_42] : memref<1x160xf32, #tpu.memory_space<vmem>>, vector<1x160xf32>
    %54 = vector.broadcast %53 : vector<1x160xf32> to vector<2x160xf32>
    %55 = arith.addf %52, %54 : vector<2x160xf32>
    %56 = vector.extract_strided_slice %55 {offsets = [0, 0], sizes = [2, 128], strides = [1, 1]} : vector<2x160xf32> to vector<2x128xf32>
    %57 = vector.extract_strided_slice %55 {offsets = [0, 128], sizes = [2, 32], strides = [1, 1]} : vector<2x160xf32> to vector<2x32xf32>
    %c0_43 = arith.constant 0 : index
    %c0_44 = arith.constant 0 : index
    %58 = vector.load %arg14[%c0_43, %c0_44] : memref<4x128xbf16, #tpu.memory_space<vmem>>, vector<4x128xbf16>
    %cst_45 = arith.constant dense<0.000000e+00> : vector<2x128xf32>
    %59 = tpu.matmul %34, %58, %cst_45 {dimension_numbers = #tpu.dot_dimension_numbers<[1], [0], [0], [1], [0, 0, 1, 1], [], []>} : vector<2x4xbf16>, vector<4x128xbf16>, vector<2x128xf32> -> vector<2x128xf32>
    %60 = arith.mulf %59, %56 : vector<2x128xf32>
    %61 = arith.truncf %60 : vector<2x128xf32> to vector<2x128xbf16>
    %c0_46 = arith.constant 0 : index
    %c0_47 = arith.constant 0 : index
    %62 = vector.load %arg15[%c0_46, %c0_47] : memref<128x32xbf16, #tpu.memory_space<vmem>>, vector<128x32xbf16>
    %cst_48 = arith.constant dense<0.000000e+00> : vector<2x32xf32>
    %63 = tpu.matmul %61, %62, %cst_48 {dimension_numbers = #tpu.dot_dimension_numbers<[1], [0], [0], [1], [0, 0, 1, 1], [], []>} : vector<2x128xbf16>, vector<128x32xbf16>, vector<2x32xf32> -> vector<2x32xf32>
    %64 = arith.addf %57, %63 : vector<2x32xf32>
    %c0_49 = arith.constant 0 : index
    %c0_50 = arith.constant 0 : index
    %65 = vector.load %arg16[%c0_49, %c0_50] : memref<2x32xf32, #tpu.memory_space<vmem>>, vector<2x32xf32>
    tpu.vector_store %arg16[%c0_49, %c0_50], %64 {strides = array<i32>} : memref<2x32xf32, #tpu.memory_space<vmem>>, vector<2x32xf32>,
    return
  }
  func.func @transform_0(%arg0: i32) -> (i32, i32) {
    %c0_i32 = arith.constant 0 : i32
    %c0_i32_0 = arith.constant 0 : i32
    return %arg0, %c0_i32 : i32, i32
  }
  func.func @transform_1(%arg0: i32) -> (i32, i32) {
    %c0_i32 = arith.constant 0 : i32
    %c0_i32_0 = arith.constant 0 : i32
    %c0_i32_1 = arith.constant 0 : i32
    return %c0_i32, %c0_i32_0 : i32, i32
  }
  func.func @transform_2(%arg0: i32) -> (i32, i32) {
    %c0_i32 = arith.constant 0 : i32
    %c0_i32_0 = arith.constant 0 : i32
    %c0_i32_1 = arith.constant 0 : i32
    return %c0_i32, %c0_i32_0 : i32, i32
  }
  func.func @transform_3(%arg0: i32) -> (i32, i32) {
    %c0_i32 = arith.constant 0 : i32
    %c0_i32_0 = arith.constant 0 : i32
    %c0_i32_1 = arith.constant 0 : i32
    return %c0_i32, %c0_i32_0 : i32, i32
  }
  func.func @transform_4(%arg0: i32) -> (i32, i32) {
    %c0_i32 = arith.constant 0 : i32
    %c0_i32_0 = arith.constant 0 : i32
    %c0_i32_1 = arith.constant 0 : i32
    return %c0_i32, %c0_i32_0 : i32, i32
  }
  func.func @transform_5(%arg0: i32) -> (i32, i32) {
    %c0_i32 = arith.constant 0 : i32
    %c0_i32_0 = arith.constant 0 : i32
    %c0_i32_1 = arith.constant 0 : i32
    return %c0_i32, %c0_i32_0 : i32, i32
  }
  func.func @transform_6(%arg0: i32) -> (i32, i32) {
    %c0_i32 = arith.constant 0 : i32
    %c0_i32_0 = arith.constant 0 : i32
    %c0_i32_1 = arith.constant 0 : i32
    return %c0_i32, %c0_i32_0 : i32, i32
  }
  func.func @transform_7(%arg0: i32) -> (i32, i32) {
    %c0_i32 = arith.constant 0 : i32
    %c0_i32_0 = arith.constant 0 : i32
    %c0_i32_1 = arith.constant 0 : i32
    return %c0_i32, %c0_i32_0 : i32, i32
  }
  func.func @transform_8(%arg0: i32) -> (i32, i32) {
    %c0_i32 = arith.constant 0 : i32
    %c0_i32_0 = arith.constant 0 : i32
    %c0_i32_1 = arith.constant 0 : i32
    return %c0_i32, %c0_i32_0 : i32, i32
  }
  func.func @transform_9(%arg0: i32) -> (i32, i32) {
    %c0_i32 = arith.constant 0 : i32
    %c0_i32_0 = arith.constant 0 : i32
    %c0_i32_1 = arith.constant 0 : i32
    return %c0_i32, %c0_i32_0 : i32, i32
  }
  func.func @transform_10(%arg0: i32) -> (i32, i32) {
    %c0_i32 = arith.constant 0 : i32
    %c0_i32_0 = arith.constant 0 : i32
    %c0_i32_1 = arith.constant 0 : i32
    return %c0_i32, %c0_i32_0 : i32, i32
  }
  func.func @transform_11(%arg0: i32) -> (i32, i32) {
    %c0_i32 = arith.constant 0 : i32
    %c0_i32_0 = arith.constant 0 : i32
    %c0_i32_1 = arith.constant 0 : i32
    return %c0_i32, %c0_i32_0 : i32, i32
  }
  func.func @transform_12(%arg0: i32) -> (i32, i32) {
    %c0_i32 = arith.constant 0 : i32
    %c0_i32_0 = arith.constant 0 : i32
    %c0_i32_1 = arith.constant 0 : i32
    return %c0_i32, %c0_i32_0 : i32, i32
  }
  func.func @transform_13(%arg0: i32) -> (i32, i32) {
    %c0_i32 = arith.constant 0 : i32
    %c0_i32_0 = arith.constant 0 : i32
    %c0_i32_1 = arith.constant 0 : i32
    return %c0_i32, %c0_i32_0 : i32, i32
  }
  func.func @transform_14(%arg0: i32) -> (i32, i32) {
    %c0_i32 = arith.constant 0 : i32
    %c0_i32_0 = arith.constant 0 : i32
    %c0_i32_1 = arith.constant 0 : i32
    return %c0_i32, %c0_i32_0 : i32, i32
  }
  func.func @transform_15(%arg0: i32) -> (i32, i32) {
    %c0_i32 = arith.constant 0 : i32
    %c0_i32_0 = arith.constant 0 : i32
    return %arg0, %c0_i32 : i32, i32
  }
}

</mosaic_0001>

<bundles_post_ra>
// kernel: tpu_custom_call.1
= control target key start
LH: loop header
LB: loop body
LE: loop exit
PB: predicated region body
PF: predicated region fallthrough
CT: control target
= control target key end

     0   :  { %v1171_v2 = vmov 0   ;;  %vm114_vm0 = vcmask 392192   ;;  %s1496_s0 = inlined_call_operand.vmem [shape: bf16[32,48], index: 0, kind: input, shape index: {}]   ;;  %s1497_s1 = inlined_call_operand.vmem [shape: bf16[48,160], index: 1, kind: input, shape index: {}]   ;;  %s1498_s2 = inlined_call_operand.vmem [shape: f32[1,160], index: 2, kind: input, shape index: {}]   ;;  %s1499_s3 = inlined_call_operand.vmem [shape: bf16[32,160], index: 3, kind: input, shape index: {}]   ;;  %s1500_s4 = inlined_call_operand.vmem [shape: f32[1,160], index: 4, kind: input, shape index: {}]   ;;  %s1501_s5 = inlined_call_operand.vmem [shape: bf16[32,8], index: 5, kind: input, shape index: {}]   ;;  %s1502_s6 = inlined_call_operand.vmem [shape: f32[1,8], index: 6, kind: input, shape index: {}]   ;;  %s1503_s7 = inlined_call_operand.vmem [shape: bf16[8,4], index: 7, kind: input, shape index: {}]   ;;  %s1504_s8 = inlined_call_operand.vmem [shape: f32[1,4], index: 8, kind: input, shape index: {}]   ;;  %s1505_s9 = inlined_call_operand.vmem [shape: bf16[2,32], index: 9, kind: input, shape index: {}]   ;;  %s1506_s10 = inlined_call_operand.vmem [shape: bf16[32,2], index: 10, kind: input, shape index: {}]   ;;  %s1507_s11 = inlined_call_operand.vmem [shape: bf16[4,128], index: 11, kind: input, shape index: {}]   ;;  %s1508_s12 = inlined_call_operand.vmem [shape: bf16[128,32], index: 12, kind: input, shape index: {}]   ;;  %s1509_s13 = inlined_call_operand.vmem [shape: bf16[4,128], index: 13, kind: input, shape index: {}]   ;;  %s1510_s14 = inlined_call_operand.vmem [shape: bf16[128,32], index: 14, kind: input, shape index: {}]   ;;  %s1511_s15 = inlined_call_operand.hbm [shape: f32[2,32], index: 15, kind: output, shape index: {}]  }
   0x1   :  { %v1112_v0 = vld [vmem:[%s1497_s1 + $0x24] ss:$8 sps:$4 sm:$0xff]   ;;  %v1114_v1 = vld [vmem:[%s1497_s1 + $0x20] ss:$8 sps:$4 sm:$0xff]   ;;  %153 = vmatprep.mubr.bf16.mxu1 %v1171_v2  ;;  %v1115_v3 = vld [vmem:[%s1497_s1 + $0x14] ss:$8 sps:$4 sm:$0xff]  }
   0x2   :  { %131 = vmatprep.subr.bf16.mxu1 %v1112_v0  ;;  %v1117_v4 = vld [vmem:[%s1497_s1 + $0x10] ss:$8 sps:$4 sm:$0xff]   ;;  %v1118_v5 = vld [vmem:[%s1497_s1 + $0x4] ss:$8 sps:$4 sm:$0xff]   ;;  %v1120_v6 = vld [vmem:[%s1497_s1] ss:$8 sps:$4 sm:$0xff]  }
   0x3   :  { %132 = vmatpush1.bf16.msra.mxu1 %v1114_v1  ;;  %v1121_v7 = vld [vmem:[%s1496_s0] sm:$0xff]   ;;  %v1122_v8 = vld [vmem:[%s1496_s0 + $0x8] sm:$0xff]  }
   0x4   :  { %133 = vmatprep.subr.bf16.mxu1 %v1115_v3 }
   0x7   :  { %134 = vmatpush1.bf16.msra.mxu1 %v1117_v4 }
   0x8   :  { %135 = vmatprep.subr.bf16.mxu1 %v1118_v5 }
   0xb   :  { %136 = vmatpush1.bf16.msra.mxu1 %v1120_v6 }
   0xe   :  { %944 = vmatmul.mubr.msk.bf16.vlgmr.msra.gmra.mxu1 %vm114_vm0, %v1121_v7 }
   0xf   :  { %163 = vmatprep.mubr.bf16.mxu1 %v1171_v2 }
  0x10   :  { %20 = vsyncpa [#allocation3], 0  ;;  %v1172_v9 = vmov 0.0   ;;  %vm1173_vm1 = vmmov 0   ;;  %v64_v11 = vlaneseq  ;;  %v1299_v18 = vld [vmem:[%s1498_s2] sm:$0x3] }
  0x11   :  { %1019 = vmatprep.subr.bf16.mxu1 %v1172_v9  ;;  %1035 = vmatprep.subr.bf16.mxu0 %v1172_v9  ;;  %v1320_v32 = vld [vmem:[%s1499_s3 + $0x14] ss:$8 sps:$4 sm:$0xff]   ;;  %v1325_v34 = vld [vmem:[%s1505_s9] sm:$0x1]  ;;  %vm181_vm2 = vcmask 261120   ;;  %v1129_v43 = vld [vmem:[%s1501_s5 + $0x8] sm:$0xff]  }
  0x12   :  { %1037 = vmatprep.mubr.msk.bf16.mxu0 %vm1173_vm1, %v1172_v9  ;;  %v1291_v14 = vshrl.u32 %v64_v11, 7  ;;  %v1330_v35 = vld [vmem:[%s1499_s3 + $0x10] ss:$8 sps:$4 sm:$0xff]   ;;  %v1336_v36 = vld [vmem:[%s1499_s3 + $0x4] ss:$8 sps:$4 sm:$0xff]   ;;  %vm386_vm3 = vcmask 1043456  }
  0x13   :  { %v1344_v37 = vld [vmem:[%s1499_s3] ss:$8 sps:$4 sm:$0xff]   ;;  %vm382_vm4 = vcmask 64512   ;;  %vm440_vm5 = vcmask 1041408   ;;  %vm436_vm6 = vcmask 31744   ;;  %vm495_vm7 = vcmask 15360  }
  0x14   :  { %v70_v16 = vsub.s32 1, %v1291_v14  ;;  %v1130_v44 = vld [vmem:[%s1501_s5] sm:$0xff]   ;;  %vm502_vm8 = vcmask 1040384   ;;  %s1174_s25 = smov [#allocation2]   ;;  %vm920_vm9 = vcmask 254976  }
  0x15   :  { %v1363_v45 = vld [vmem:[%s1500_s4] sm:$0x3]  ;;  %s928_s9 = sshll.u32 %s1174_s25, 4  ;;  %s929_s9 = int_to_ptr.vmem [resolvable:$true] %s928_s9 }
  0x16   :  { %945 = vmatmul.mubr.msk.bf16.gmra.mxu1 %vm114_vm0, %v1122_v8  ;;  %v71_v20 = vrot.slane %v1299_v18, %v70_v16  ;;  %v1366_v46 = vrot.slane %v1363_v45, %v70_v16  ;;  %v374_v53 = vld [vmem:[%s1503_s7] sm:$0xf]  ;;  %v1135_v16 = vld [vmem:[%s1508_s12 + $0x28] sm:$0xff]   ;;  %p1154_p1 = scmp.lt.s32.totalorder %s929_s9, %s929_s9 }
  0x17   :  { %1023 = vmatprep.mubr.msk.bf16.mxu1 %vm1173_vm1, %v1172_v9  ;;  %v388_v54 = vsel %vm386_vm3, %v374_v53, 0  ;;  %v952_v55 = vld [vmem:[%s1502_s6] ss:$0 sm:$0xff] }
  0x18   :  { %1036 = vmatpush3.bf16.msra.mxu0 %v388_v54  ;;  %v435_v63 = vld [vmem:[%s1507_s11] sm:$0x3] }
  0x19   :  { %1041 = vmatprep.subr.bf16.mxu0 %v1172_v9  ;;  %v442_v0 = vsel %vm440_vm5, %v435_v63, 0  ;;  %v956_v1 = vld [vmem:[%s1504_s8] ss:$0 sm:$0xff] }
  0x1a   :  { %v1131_v11 = vld [vmem:[%s1506_s10] sm:$0xff]  }
  0xce   :  { %v1287_v10 = vpop.f32.mrf.mxu1 }
  0xd0   :  { %v157_v12 = vpop.f32.mrf.mxu1 }
  0xd1   :  { %v1310_v26 = vadd.f32 %v157_v12, %v71_v20  ;;  %v1133_v12 = vld [vmem:[%s1508_s12 + $0x38] sm:$0xff]  }
  0xd2   :  { %v1289_v13 = vpop.f32.mrf.mxu1 }
  0xd3   :  { %v175_v31 = vmax.f32 %v1310_v26, 0.0 }
  0xd4   :  { %v161_v15 = vpop.f32.mrf.mxu1 }
  0xd5   :  { %v1306_v24 = vadd.f32 %v161_v15, %v71_v20  ;;  %v1134_v15 = vld [vmem:[%s1508_s12 + $0x30] sm:$0xff]  }
  0xd6   :  { %v1294_v17 = vpop.f32.mrf.mxu1 }
  0xd7   :  { %v176_v29 = vmax.f32 %v1306_v24, 0.0 }
  0xd8   :  { %v167_v19 = vpop.f32.mrf.mxu1 }
  0xd9   :  { %v1304_v22 = vadd.f32 %v167_v19, %v71_v20  ;;  %v179_v33 = vpack.c.bf16 %v176_v29, %v175_v31  ;;  %v1136_v19 = vld [vmem:[%s1508_s12 + $0x20] sm:$0xff]  }
  0xda   :  { %v1302_v21 = vpop.f32.mrf.mxu1 }
  0xdb   :  { %v177_v27 = vmax.f32 %v1304_v22, 0.0 }
  0xdc   :  { %v171_v23 = vpop.f32.mrf.mxu1 }
  0xdd   :  { %v1308_v25 = vadd.f32 %v171_v23, %v71_v20  ;;  %v1137_v20 = vld [vmem:[%s1508_s12 + $0x18] sm:$0xff]  }
  0xdf   :  { %v178_v28 = vmax.f32 %v1308_v25, 0.0 }
  0xe1   :  { %v180_v30 = vpack.c.bf16 %v178_v28, %v177_v27 }
  0xe3   :  { %1020 = vmatpush3.bf16.msra.mxu1 %v180_v30  ;;  %v1132_v30 = vld [vmem:[%s1506_s10 + $0x8] sm:$0xff]  }
  0xe4   :  { %1021 = vmatprep.subr.bf16.mxu1 %v1172_v9 }
  0xe7   :  { %1022 = vmatpush3.bf16.msra.mxu1 %v179_v33 }
  0xe8   :  { %277 = vmatprep.subr.bf16.mxu1 %v1320_v32 }
  0xea   :  { %1024 = vmatmul.mubr.msk.bf16.vlgmr.msra.gmra.mxu1 %vm181_vm2, %v1325_v34 }
  0xeb   :  { %278 = vmatpush1.bf16.msra.mxu1 %v1330_v35  ;;  %297 = vmatprep.mubr.bf16.mxu1 %v1171_v2 }
  0xec   :  { %279 = vmatprep.subr.bf16.mxu1 %v1336_v36 }
  0xef   :  { %280 = vmatpush1.bf16.msra.mxu1 %v1344_v37 }
  0xf0   :  { %1027 = vmatprep.subr.bf16.mxu1 %v1172_v9 }
 0x1aa   :  { %v219_v38 = vpop.f32.mrf.mxu1 }
 0x1ab   :  { %v225_v39 = vpack.c.bf16 %v219_v38, %v219_v38  ;;  %v1138_v38 = vld [vmem:[%s1508_s12 + $0x10] sm:$0xff]  }
 0x1ac   :  { %v1025_v40 = vpop.f32.mrf.mxu1 }
 0x1ad   :  { %951 = vmatmul.mubr.msk.bf16.vlgmr.msra.gmra.mxu1 %vm181_vm2, %v225_v39  ;;  %v1139_v39 = vld [vmem:[%s1508_s12 + $0x8] sm:$0xff]   ;;  %v1140_v40 = vld [vmem:[%s1508_s12] sm:$0xff]  }
 0x1ae   :  { %v222_v41 = vpop.f32.mrf.mxu1  ;;  %1031 = vmatprep.mubr.msk.bf16.mxu1 %vm1173_vm1, %v1172_v9  ;;  %1028 = vmatpush3.bf16.msra.mxu1 %v1129_v43 }
 0x1af   :  { %1029 = vmatprep.subr.bf16.mxu1 %v1172_v9  ;;  %v66_v41 = vsub.s32 0, %v1291_v14 }
 0x1b0   :  { %v1026_v42 = vpop.f32.mrf.mxu1 }
 0x1b1   :  { %v67_v43 = vrot.slane %v1299_v18, %v66_v41 }
 0x1b2   :  { %1030 = vmatpush3.bf16.msra.mxu1 %v1130_v44 }
 0x1b3   :  { %1053 = vmatprep.subr.bf16.mxu1 %v1133_v12 }
 0x26d   :  { %v299_v47 = vpop.f32.mrf.mxu1 }
 0x26e   :  { %v166_v47 = vadd.f32 %v1294_v17, %v67_v43 }
 0x26f   :  { %v300_v48 = vpop.f32.mrf.mxu1 }
 0x270   :  { %v301_v49 = vadd.f32 %v300_v48, %v1366_v46  ;;  %v170_v48 = vadd.f32 %v1302_v21, %v67_v43 }
 0x271   :  { %v302_v50 = vpop.f32.mrf.mxu1 }
 0x272   :  { %v305_v51 = vpack.c.bf16 %v301_v49, %v301_v49  ;;  %v156_v50 = vadd.f32 %v1287_v10, %v67_v43 }
 0x273   :  { %v303_v52 = vpop.f32.mrf.mxu1 }
 0x274   :  { %1032 = vmatmul.mubr.msk.bf16.vlgmr.msra.gmra.mxu1 %vm181_vm2, %v305_v51  ;;  %v160_v51 = vadd.f32 %v1289_v13, %v67_v43 }
 0x275   :  { %1054 = vmatpush3.bf16.msra.mxu1 %v1133_v12 }
 0x276   :  { %1055 = vmatprep.subr.bf16.mxu1 %v1134_v15 }
 0x279   :  { %1056 = vmatpush3.bf16.msra.mxu1 %v1134_v15 }
 0x27a   :  { %1057 = vmatprep.subr.bf16.mxu1 %v1135_v16 }
 0x27d   :  { %1058 = vmatpush3.bf16.msra.mxu1 %v1135_v16  ;;  %v235_v16 = vrot.slane %v1363_v45, %v66_v41 }
 0x27e   :  { %1059 = vmatprep.subr.bf16.mxu1 %v1136_v19 }
 0x281   :  { %1060 = vmatpush3.bf16.msra.mxu1 %v1136_v19 }
 0x282   :  { %1061 = vmatprep.subr.bf16.mxu1 %v1137_v20 }
 0x285   :  { %1062 = vmatpush3.bf16.msra.mxu1 %v1137_v20 }
 0x286   :  { %1063 = vmatprep.subr.bf16.mxu1 %v1138_v38 }
 0x289   :  { %1064 = vmatpush3.bf16.msra.mxu1 %v1138_v38 }
 0x28a   :  { %1065 = vmatprep.subr.bf16.mxu1 %v1139_v39 }
 0x28d   :  { %1066 = vmatpush3.bf16.msra.mxu1 %v1139_v39 }
 0x28e   :  { %1067 = vmatprep.subr.bf16.mxu1 %v1140_v40 }
 0x291   :  { %1068 = vmatpush3.bf16.msra.mxu1 %v1140_v40 }
 0x334   :  { %v366_v56 = vpop.f32.mrf.mxu1 }
 0x335   :  { %v367_v57 = vadd.f32 %v952_v55, %v366_v56 }
 0x336   :  { %v1033_v58 = vpop.f32.mrf.mxu1 }
 0x337   :  { %v372_v59 = vmax.f32 %v367_v57, 0.0 }
 0x338   :  { %v369_v60 = vpop.f32.mrf.mxu1 }
 0x339   :  { %v373_v61 = vpack.c.bf16 %v372_v59, %v372_v59 }
 0x33a   :  { %v1034_v62 = vpop.f32.mrf.mxu1 }
 0x33b   :  { %1038 = vmatmul.mubr.msk.bf16.vlgmr.msra.gmra.mxu0 %vm382_vm4, %v373_v61 }
 0x33c   :  { %1043 = vmatprep.mubr.msk.bf16.mxu0 %vm1173_vm1, %v1172_v9  ;;  %1042 = vmatpush3.bf16.msra.mxu0 %v442_v0 }
 0x3fb   :  { %v424_v3 = vpop.f32.mrf.mxu0 }
 0x3fc   :  { %v425_v4 = vadd.f32 %v956_v1, %v424_v3 }
 0x3fd   :  { %v1039_v5 = vpop.f32.mrf.mxu0 }
 0x3fe   :  { %v1386_v6 = vpack.c.bf16 %v425_v4, %v425_v4  ;;  %v1144_v5 = vld [vmem:[%s1510_s14 + $0x20] sm:$0xff]  }
 0x3ff   :  { %v427_v7 = vpop.f32.mrf.mxu0 }
 0x400   :  { %1044 = vmatmul.mubr.msk.bf16.vlgmr.msra.gmra.mxu0 %vm436_vm6, %v1386_v6  ;;  %v1146_v7 = vld [vmem:[%s1510_s14 + $0x10] sm:$0xff]  }
 0x401   :  { %v1040_v8 = vpop.f32.mrf.mxu0  ;;  %1049 = vmatprep.mubr.msk.bf16.mxu0 %vm495_vm7, %v1131_v11  ;;  %v1148_v11 = vld [vmem:[%s1510_s14] sm:$0xff]  }
 0x402   :  { %v1147_v8 = vld [vmem:[%s1510_s14 + $0x8] sm:$0xff]  }
 0x4c0   :  { %v478_v23 = vpop.f32.mrf.mxu0 }
 0x4c1   :  { %v484_v27 = vpack.c.bf16 %v478_v23, %v478_v23 }
 0x4c2   :  { %v1045_v28 = vpop.f32.mrf.mxu0 }
 0x4c3   :  { %v504_v29 = vsel %vm502_vm8, %v484_v27, 0  ;;  %1107 = vmatprep.subr.msk.bf16.mxu0 %vm502_vm8, %v484_v27 }
 0x4c4   :  { %v481_v31 = vpop.f32.mrf.mxu0  ;;  %1048 = vmatpush3.bf16.msra.mxu0 %v504_v29 }
 0x4c5   :  { %1073 = vmatprep.subr.bf16.mxu0 %v1172_v9 }
 0x4c6   :  { %v1046_v33 = vpop.f32.mrf.mxu0 }
 0x4c7   :  { %1050 = vmatmul.mubr.msk.bf16.vlgmr.msra.gmra.mxu0 %vm495_vm7, %v1132_v30 }
 0x4c8   :  { %1077 = vmatprep.mubr.msk.bf16.mxu0 %vm1173_vm1, %v1172_v9 }
 0x587   :  { %v1051_v42 = vpop.f32.mrf.mxu0 }
 0x588   :  { %v557_v52 = vmul.f32 %v1051_v42, %v166_v47 }
 0x589   :  { %v540_v44 = vpop.f32.mrf.mxu0 }
 0x58a   :  { %v555_v55 = vmul.f32 %v540_v44, %v156_v50 }
 0x58b   :  { %v1052_v49 = vpop.f32.mrf.mxu0 }
 0x58c   :  { %v558_v53 = vmul.f32 %v1052_v49, %v170_v48 }
 0x58d   :  { %v543_v54 = vpop.f32.mrf.mxu0 }
 0x58e   :  { %v560_v56 = vpack.c.bf16 %v558_v53, %v557_v52  ;;  %v556_v57 = vmul.f32 %v543_v54, %v160_v51 }
 0x590   :  { %v559_v58 = vpack.c.bf16 %v556_v57, %v555_v55 }
 0x592   :  { %1069 = vmatprep.mubr.bf16.mxu1 %v559_v58 }
 0x593   :  { %1070 = vmatmul.mubr.bf16.vlgmr.msra.gmra.mxu1 %v560_v56 }
 0x653   :  { %v1071_v18 = vpop.f32.mrf.mxu1 }
 0x654   :  { %v676_v17 = vadd.f32 %v1071_v18, %v1304_v22  ;;  %v769_v22 = vld [vmem:[%s1509_s13] sm:$0x3] }
 0x655   :  { %v659_v59 = vpop.f32.mrf.mxu1 }
 0x656   :  { %v680_v10 = vmax.f32 %v676_v17, 0.0  ;;  %v674_v13 = vadd.f32 %v659_v59, %v1310_v26  ;;  %v771_v26 = vsel %vm440_vm5, %v769_v22, 0 }
 0x657   :  { %v1072_v60 = vpop.f32.mrf.mxu1 }
 0x658   :  { %v677_v21 = vadd.f32 %v1072_v60, %v1308_v25  ;;  %v678_v3 = vmax.f32 %v674_v13, 0.0 }
 0x659   :  { %v662_v61 = vpop.f32.mrf.mxu1 }
 0x65a   :  { %v681_v62 = vmax.f32 %v677_v21, 0.0  ;;  %v675_v63 = vadd.f32 %v662_v61, %v1306_v24 }
 0x65c   :  { %v683_v0 = vpack.c.bf16 %v681_v62, %v680_v10  ;;  %v679_v1 = vmax.f32 %v675_v63, 0.0 }
 0x65e   :  { %1074 = vmatpush3.bf16.msra.mxu0 %v683_v0  ;;  %v682_v4 = vpack.c.bf16 %v679_v1, %v678_v3 }
 0x65f   :  { %1075 = vmatprep.subr.bf16.mxu0 %v1172_v9 }
 0x662   :  { %1076 = vmatpush3.bf16.msra.mxu0 %v682_v4 }
 0x663   :  { %740 = vmatprep.subr.bf16.mxu0 %v1320_v32 }
 0x665   :  { %1078 = vmatmul.mubr.msk.bf16.vlgmr.msra.gmra.mxu0 %vm181_vm2, %v1325_v34 }
 0x666   :  { %741 = vmatpush1.bf16.msra.mxu0 %v1330_v35  ;;  %760 = vmatprep.mubr.bf16.mxu0 %v1171_v2  ;;  %v1141_v35 = vld [vmem:[%s1510_s14 + $0x38] sm:$0xff]  }
 0x667   :  { %742 = vmatprep.subr.bf16.mxu0 %v1336_v36  ;;  %v1142_v36 = vld [vmem:[%s1510_s14 + $0x30] sm:$0xff]  }
 0x66a   :  { %743 = vmatpush1.bf16.msra.mxu0 %v1344_v37  ;;  %v1143_v37 = vld [vmem:[%s1510_s14 + $0x28] sm:$0xff]  }
 0x66b   :  { %1081 = vmatprep.subr.bf16.mxu0 %v1172_v9 }
 0x725   :  { %v718_v24 = vpop.f32.mrf.mxu0 }
 0x726   :  { %v724_v25 = vpack.c.bf16 %v718_v24, %v718_v24 }
 0x727   :  { %v1079_v32 = vpop.f32.mrf.mxu0 }
 0x728   :  { %972 = vmatmul.mubr.msk.bf16.vlgmr.msra.gmra.mxu0 %vm181_vm2, %v724_v25 }
 0x729   :  { %v721_v34 = vpop.f32.mrf.mxu0  ;;  %1082 = vmatpush3.bf16.msra.mxu0 %v771_v26  ;;  %1083 = vmatprep.mubr.msk.bf16.mxu0 %vm1173_vm1, %v1172_v9 }
 0x72a   :  { %1087 = vmatprep.subr.bf16.mxu0 %v1172_v9 }
 0x72b   :  { %v1080_v2 = vpop.f32.mrf.mxu0 }
 0x730   :  { %1084 = vmatmul.mubr.msk.bf16.vlgmr.msra.gmra.mxu0 %vm436_vm6, %v1386_v6  ;;  %v1145_v6 = vld [vmem:[%s1510_s14 + $0x18] sm:$0xff]   ;;  %s1149_s14 = scalar_lea.vmem %s929_s9, 32 }
 0x731   :  { %1088 = vmatpush3.bf16.msra.mxu0 %v1141_v35  ;;  %1103 = vmatprep.mubr.msk.bf16.mxu0 %vm1173_vm1, %v1172_v9  ;;  %p1150_p0 = scmp.ne.s32.totalorder %s929_s9, %s1149_s14  ;;  %p1155_p2 = scmp.lt.s32.totalorder %s1149_s14, %s1149_s14 }
 0x732   :  { %1089 = vmatprep.subr.bf16.mxu0 %v1172_v9 }
 0x733   :  { %p1156_p3 = por %p1155_p2, %p1154_p1 }
 0x735   :  { %1090 = vmatpush3.bf16.msra.mxu0 %v1142_v36  ;;  %p1157_p4 = pnand %p1156_p3, %p1150_p0 }
 0x736   :  { %1091 = vmatprep.subr.bf16.mxu0 %v1172_v9 }
 0x739   :  { %1092 = vmatpush3.bf16.msra.mxu0 %v1143_v37 }
 0x73a   :  { %1093 = vmatprep.subr.bf16.mxu0 %v1172_v9 }
 0x73d   :  { %1094 = vmatpush3.bf16.msra.mxu0 %v1144_v5 }
 0x73e   :  { %1095 = vmatprep.subr.bf16.mxu0 %v1172_v9 }
 0x741   :  { %1096 = vmatpush3.bf16.msra.mxu0 %v1145_v6 }
 0x742   :  { %1097 = vmatprep.subr.bf16.mxu0 %v1172_v9 }
 0x745   :  { %1098 = vmatpush3.bf16.msra.mxu0 %v1146_v7 }
 0x746   :  { %1099 = vmatprep.subr.bf16.mxu0 %v1172_v9 }
 0x749   :  { %1100 = vmatpush3.bf16.msra.mxu0 %v1147_v8 }
 0x74a   :  { %1101 = vmatprep.subr.bf16.mxu0 %v1172_v9 }
 0x74d   :  { %1102 = vmatpush3.bf16.msra.mxu0 %v1148_v11 }
 0x7e8   :  { %v762_v12 = vpop.f32.mrf.mxu0 }
 0x7e9   :  { %v763_v23 = vadd.f32 %v762_v12, %v235_v16 }
 0x7ea   :  { %v764_v15 = vpop.f32.mrf.mxu0 }
 0x7eb   :  { %v765_v33 = vadd.f32 %v764_v15, %v1366_v46 }
 0x7ec   :  { %v766_v19 = vpop.f32.mrf.mxu0 }
 0x7ee   :  { %v767_v20 = vpop.f32.mrf.mxu0 }
 0x7f0   :  { %v807_v27 = vpop.f32.mrf.mxu0 }
 0x7f1   :  { %v813_v28 = vmul.f32 %v807_v27, %v763_v23 }
 0x7f2   :  { %v1085_v29 = vpop.f32.mrf.mxu0 }
 0x7f3   :  { %v814_v30 = vpack.c.bf16 %v813_v28, %v813_v28 }
 0x7f4   :  { %v810_v31 = vpop.f32.mrf.mxu0 }
 0x7f5   :  { %1104 = vmatmul.mubr.bf16.vlgmr.msra.gmra.mxu0 %v814_v30 }
 0x7f6   :  { %v1086_v9 = vpop.f32.mrf.mxu0 }
 0x8b5   :  { %v913_v38 = vpop.f32.mrf.mxu0 }
 0x8b6   :  { %v919_v39 = vadd.f32 %v913_v38, %v765_v33 }
 0x8b7   :  { %v1105_v14 = vpop.f32.mrf.mxu0 }
 0x8b8   :  { %921 = vst.msk [vmem:[#allocation2] sm:$0x3] %vm920_vm9, %v919_v39 }
 0x8b9   :  { %v916_v45 = vpop.f32.mrf.mxu0 }
 0x8ba   :  { %1160 = shalt.err (!%p1157_p4)
}
 0x8bb   :  { %931 = dma.vmem_to_hbm [thread:$0]  %s929_s9, 32, %s1511_s15, [#allocation3]   ;;  %v1106_v40 = vpop.f32.mrf.mxu0 }
 0x8bc   :  { %1169 = dma.done.wait [#allocation3], 32  }
 0x8bd   :  { %1170 = vsyncadd [#allocation3], 4294967264 }
 0x8be   :  { %935 = vsyncpa [#allocation3], 1 }

</bundles_post_ra>
